<compile_context>
chip_gen: v7x
topology: tpu7x:2x2x1
jax: 0.10.0
libtpu: 0.0.40
codegen_flags: <defaults>
</compile_context>

<pallas_src>
import functools

import jax
import jax.numpy as jnp
from jax import lax
from jax.experimental import pallas as pl
from jax.experimental.pallas import tpu as pltpu

LAMBDA_SR = 1.0
LAMBDA_SR_L1 = 0.01
LAMBDA_DICT_CONSTR = 0.1

_LANE = 128


def _round_up(x, m):
    return ((x + m - 1) // m) * m


def _vmem_capacity_bytes():
    try:
        info = pltpu.get_tpu_info()
        cap = getattr(info, "vmem_capacity_bytes", None)
        if cap:
            return int(cap)
    except Exception:
        pass
    return 64 * 1024 * 1024        # conservative (v7x-sized) fallback


def _pick_tile_n(F, S, K, x_itemsize, mm_itemsize, budget_bytes):
    """Largest lane tile TN (multiple of 128) that fits the VMEM budget."""
    # Resident, double-buffered blocks that do not scale with TN.
    fixed = 2 * K * F * S * (4 + mm_itemsize)        # f32 + matmul-dtype dictionaries
    fixed += 2 * _LANE * 4                           # output block
    # Per-column (per-lane) bytes.
    per_lane = 2 * (4 + 4 * F + x_itemsize * K * S)  # double-buffered labels/feature/X
    per_lane += 2 * 4                                # two f32 accumulator rows
    per_lane += 4 * (3 * F + 3 * S)                  # recon/err/abs/cast intermediates
    avail = budget_bytes - fixed
    tn = (int(avail // per_lane) // _LANE) * _LANE
    return max(_LANE, min(tn, 32768))


def _cocsr_dict_loss_kernel(lab_ref, feat_ref, x_ref, dict_f32_ref, dict_mm_ref,
                            out_ref,                       # output
                            acc_sr, acc_l1,                # scratch
                            *, n_valid, matmul_dtype):
    t = pl.program_id(1)
    t_last = pl.num_programs(1) - 1

    @pl.when(t == 0)
    def _init():
        acc_sr[...] = jnp.zeros_like(acc_sr)
        acc_l1[...] = jnp.zeros_like(acc_l1)

    K = dict_mm_ref.shape[0]
    tn = lab_ref.shape[-1]

    # Logical (unclamped) tile index -> global column index of every lane.
    # Duplicate clamped steps and the ragged last tile both fail `col < N`.
    step = pl.program_id(0) * pl.num_programs(1) + pl.program_id(1)
    col = step * tn + lax.broadcasted_iota(jnp.int32, (1, tn), 1)
    col_valid = col < n_valid                               # [1, TN] bool

    labels = lab_ref[...]                                   # [1, TN] int32
    ft = feat_ref[...].astype(jnp.float32)                  # [F, TN]

    sr_cols = jnp.zeros((1, tn), jnp.float32)
    l1_cols = jnp.zeros((1, tn), jnp.float32)
    # K is a small static int: unrolled at trace time; the full dictionary
    # stays resident in VMEM (constant block index) so this does not restream
    # feature / labels / X per dictionary.
    for k in range(K):
        member = jnp.logical_and(col_valid, labels == k)    # [1, TN]
        xk = x_ref[k]                                       # [S, TN] storage dtype
        recon = jnp.dot(dict_mm_ref[k], xk.astype(matmul_dtype),
                        preferred_element_type=jnp.float32)  # [F, TN] f32
        err = ft - recon                                     # f32 elementwise
        sq = jnp.sum(err * err, axis=0, keepdims=True)       # [1, TN]
        l1 = jnp.sum(jnp.abs(xk.astype(jnp.float32)), axis=0, keepdims=True)
        # jnp.where (not multiply-by-mask) so garbage in out-of-bounds columns
        # cannot poison the sums (0 * inf = nan).
        sr_cols = sr_cols + jnp.where(member, sq, 0.0)
        l1_cols = l1_cols + jnp.where(member, l1, 0.0)

    acc_sr[...] += sr_cols
    acc_l1[...] += l1_cols

    @pl.when(t == t_last)
    def _finalize():
        # Dictionary unit-norm-column constraint: once per group, always f32.
        dc = jnp.float32(0.0)
        for k in range(K):
            dk = dict_f32_ref[k]                                      # [F, S]
            colnorm_sq = jnp.sum(dk * dk, axis=0, keepdims=True)      # [1, S]
            dc = dc + jnp.sum((colnorm_sq - 1.0) ** 2)
        sr_p = jnp.sum(acc_sr[...])                                   # scalar
        l1_p = jnp.sum(acc_l1[...])                                   # scalar
        lane = lax.broadcasted_iota(jnp.int32, out_ref.shape, 2)
        out_ref[...] = (jnp.where(lane == 0, sr_p, 0.0)
                        + jnp.where(lane == 1, l1_p, 0.0)
                        + jnp.where(lane == 2, dc, 0.0)).astype(jnp.float32)


def cocsr_dictionary_learning_loss(dict_labels, feature, all_x, all_x_ds,
                                   all_dict, *, tile_n=None,
                                   num_parallel_groups=2,
                                   matmul_dtype=jnp.bfloat16,
                                   vmem_budget_bytes=None,
                                   vmem_limit_bytes=None):
    """Forward pass of CocsrDictionaryLearningLoss (default options).

    dict_labels : [N]        int   dictionary index of each sample
    feature     : [N, F]     float SR feature
    all_x       : [K, S, N]  float sparse reconstruction coefficients
                             (streamed as-is; pass bf16 to halve HBM traffic)
    all_x_ds    : list       deep-supervision coefficients (ignored: option
                             compute_sr_deep_supervision defaults to False)
    all_dict    : [K, F, S]  float sparse dictionaries
    returns scalar loss_for_learning.
    """
    # TODO(synk): deep-supervision branch (all_x_ds) not implemented; the
    # default option disables it (and the reference's `.detatch()` typo means
    # it could never run with a non-empty list anyway).
    del all_x_ds

    all_x = jnp.asarray(all_x)                                # no pad, no copy
    all_dict_f32 = jnp.asarray(all_dict, jnp.float32)         # [K, F, S]
    all_dict_mm = all_dict_f32.astype(matmul_dtype)           # hoisted MXU cast
    labels2d = jnp.asarray(dict_labels, jnp.int32).reshape(1, -1)   # [1, N]
    feature_t = jnp.asarray(feature).T.astype(jnp.float32)          # [F, N]

    K, F, S = all_dict_f32.shape
    N = all_x.shape[-1]

    cap = _vmem_capacity_bytes()
    if vmem_budget_bytes is None:
        # ~24 MiB on v7x (64 MiB VMEM), ~48 MiB on v5e/v6e (128 MiB VMEM).
        vmem_budget_bytes = min(int(cap * 3 // 8), 48 * 1024 * 1024)
    if vmem_limit_bytes is None:
        vmem_limit_bytes = min(int(cap * 3 // 4), 100 * 1024 * 1024)

    if tile_n is None:
        tn_cap = _pick_tile_n(F, S, K, all_x.dtype.itemsize,
                              jnp.dtype(matmul_dtype).itemsize,
                              vmem_budget_bytes)
    else:
        tn_cap = max(_LANE, _round_up(int(tile_n), _LANE))

    if N <= tn_cap:
        TN, nt = N, 1             # full-extent last dim: always a legal block
    else:
        TN = tn_cap
        nt = -(-N // TN)

    G = max(1, min(int(num_parallel_groups), nt))
    TPG = -(-nt // G)

    def _data_idx(g, t):
        # Clamp so duplicate trailing steps (when G*TPG > nt) never produce a
        # fully out-of-bounds window; their columns fail `col < N` in-kernel.
        return jnp.minimum(g * TPG + t, nt - 1)

    kernel = functools.partial(_cocsr_dict_loss_kernel,
                               n_valid=N, matmul_dtype=matmul_dtype)

    partials = pl.pallas_call(
        kernel,
        out_shape=jax.ShapeDtypeStruct((G, 1, _LANE), jnp.float32),
        grid_spec=pltpu.PrefetchScalarGridSpec(
            num_scalar_prefetch=0,
            grid=(G, TPG),
            in_specs=[
                pl.BlockSpec((1, TN), lambda g, t: (0, _data_idx(g, t))),      # labels
                pl.BlockSpec((F, TN), lambda g, t: (0, _data_idx(g, t))),      # feature^T
                pl.BlockSpec((K, S, TN), lambda g, t: (0, 0, _data_idx(g, t))),  # X
                pl.BlockSpec((K, F, S), lambda g, t: (0, 0, 0)),               # dict f32 (resident)
                pl.BlockSpec((K, F, S), lambda g, t: (0, 0, 0)),               # dict matmul-dtype (resident)
            ],
            out_specs=pl.BlockSpec((1, 1, _LANE), lambda g, t: (g, 0, 0)),
            scratch_shapes=[
                pltpu.VMEM((1, TN), jnp.float32),    # masked sq-error partial
                pltpu.VMEM((1, TN), jnp.float32),    # masked L1 partial
            ],
        ),
        compiler_params=pltpu.CompilerParams(
            dimension_semantics=("parallel", "arbitrary"),
            vmem_limit_bytes=vmem_limit_bytes,
        ),
    )(labels2d, feature_t, all_x, all_dict_f32, all_dict_mm)

    sr_sum = jnp.sum(partials[:, 0, 0])
    l1_sum = jnp.sum(partials[:, 0, 1])
    dc_sum = partials[0, 0, 2]          # identical in every group; take group 0
    return (LAMBDA_SR * sr_sum / N
            + LAMBDA_SR_L1 * l1_sum / N
            + LAMBDA_DICT_CONSTR * dc_sum / (K * S))


def _reference_loss(dict_labels, feature, all_x, all_dict,
                    matmul_dtype=jnp.bfloat16):
    """Pure-JAX reference with identical semantics (matmul in same dtype)."""
    K, F, S = all_dict.shape
    N = all_x.shape[-1]
    feat_t = feature.T.astype(jnp.float32)
    mask = (dict_labels[None, :] == jnp.arange(K)[:, None]).astype(jnp.float32)

    recon = jnp.einsum("kfs,ksn->kfn",
                       all_dict.astype(matmul_dtype),
                       all_x.astype(matmul_dtype),
                       preferred_element_type=jnp.float32)       # [K, F, N]
    err = feat_t[None] - recon
    sr = jnp.sum((err ** 2).sum(axis=1) * mask) / N
    l1 = jnp.sum(jnp.abs(all_x.astype(jnp.float32)).sum(axis=1) * mask) / N
    colnorm_sq = jnp.sum(all_dict.astype(jnp.float32) ** 2, axis=1)  # [K, S]
    dc = jnp.sum((colnorm_sq - 1.0) ** 2) / (K * S)
    return LAMBDA_SR * sr + LAMBDA_SR_L1 * l1 + LAMBDA_DICT_CONSTR * dc


if __name__ == "__main__":
    key = jax.random.PRNGKey(0)

    # --- case 1: small shapes consistent with the module's forward ---------
    K, F, S, N = 2, 16, 32, 8
    k1, k2, k3, key = jax.random.split(key, 4)
    dict_labels = jnp.array([0, 1, 0, 1, 0, 1, 0, 1], dtype=jnp.int32)  # [N]
    feature = jax.random.normal(k1, (N, F), dtype=jnp.float32)          # [N, F]
    all_x = 0.1 * jax.random.normal(k2, (K, S, N), dtype=jnp.float32)   # [K, S, N]
    all_dict = jax.random.normal(k3, (K, F, S), dtype=jnp.float32)      # [K, F, S]
    all_dict = all_dict / jnp.linalg.norm(all_dict, axis=1, keepdims=True)

    loss = cocsr_dictionary_learning_loss(dict_labels, feature, all_x,
                                          [], all_dict)
    loss = jax.block_until_ready(loss)
    ref = _reference_loss(dict_labels, feature, all_x, all_dict)
    assert jnp.allclose(loss, ref, rtol=2e-3, atol=2e-3), (loss, ref)

    # --- case 2: auto tiling (single full-N tile, N not multiple of 128) ----
    K2, F2, S2, N2 = 3, 32, 64, 300
    k1, k2, k3, k4 = jax.random.split(key, 4)
    labels2 = jax.random.randint(k1, (N2,), 0, K2, dtype=jnp.int32)
    feature2 = jax.random.normal(k2, (N2, F2), dtype=jnp.float32)
    all_x2 = 0.1 * jax.random.normal(k3, (K2, S2, N2), dtype=jnp.float32)
    all_dict2 = jax.random.normal(k4, (K2, F2, S2), dtype=jnp.float32)
    all_dict2 = all_dict2 / jnp.linalg.norm(all_dict2, axis=1, keepdims=True)

    ref2 = _reference_loss(labels2, feature2, all_x2, all_dict2)
    loss2 = cocsr_dictionary_learning_loss(labels2, feature2, all_x2,
                                           [], all_dict2)
    loss2 = jax.block_until_ready(loss2)
    assert jnp.allclose(loss2, ref2, rtol=2e-3, atol=2e-3), (loss2, ref2)

    # --- case 3: forced small tile -> multi-tile accumulation, ragged last
    #     tile, parallel groups and clamped duplicate steps ------------------
    loss3 = cocsr_dictionary_learning_loss(labels2, feature2, all_x2,
                                           [], all_dict2,
                                           tile_n=128, num_parallel_groups=2)
    loss3 = jax.block_until_ready(loss3)
    assert jnp.allclose(loss3, ref2, rtol=2e-3, atol=2e-3), (loss3, ref2)

    print("KERNEL_OK")
</pallas_src>

<mosaic_0001>
module attributes {stable_mosaic.version = 11 : i64} {
  func.func @_cocsr_dict_loss_kernel(%arg0: i32, %arg1: i32, %arg2: memref<1x8xi32, #tpu.memory_space<vmem>>, %arg3: memref<16x8xf32, #tpu.memory_space<vmem>>, %arg4: memref<2x32x8xf32, #tpu.memory_space<vmem>>, %arg5: memref<2x16x32xf32, #tpu.memory_space<vmem>>, %arg6: memref<2x16x32xbf16, #tpu.memory_space<vmem>>, %arg7: memref<1x1x128xf32, #tpu.memory_space<vmem>>, %arg8: memref<1x8xf32, #tpu.memory_space<vmem>>, %arg9: memref<1x8xf32, #tpu.memory_space<vmem>>) attributes {dimension_semantics = [#tpu.dimension_semantics<parallel>, #tpu.dimension_semantics<arbitrary>], iteration_bounds = array<i64: 1, 1>, scalar_prefetch = 0 : i64, scratch_operands = 2 : i64, tpu.core_type = #tpu.core_type<tc>, window_params = [{transform_indices = @transform_0, window_bounds = array<i64: 1, 8>}, {transform_indices = @transform_1, window_bounds = array<i64: 16, 8>}, {transform_indices = @transform_2, window_bounds = array<i64: 2, 32, 8>}, {pipeline_mode = #tpu.pipeline_mode<synchronous>, transform_indices = @transform_3, window_bounds = array<i64: 2, 16, 32>}, {pipeline_mode = #tpu.pipeline_mode<synchronous>, transform_indices = @transform_4, window_bounds = array<i64: 2, 16, 32>}, {transform_indices = @transform_5, window_bounds = array<i64: 1, 1, 128>}]} {
    %c0_i32 = arith.constant 0 : i32
    %0 = arith.cmpi eq, %arg1, %c0_i32 : i32
    %1 = arith.extui %0 : i1 to i32
    %c0_i32_0 = arith.constant 0 : i32
    %2 = arith.cmpi ne, %1, %c0_i32_0 : i32
    scf.if %2 {
      %cst_39 = arith.constant 0.000000e+00 : f32
      %68 = vector.broadcast %cst_39 : f32 to vector<1x8xf32>
      %c0_40 = arith.constant 0 : index
      %c0_41 = arith.constant 0 : index
      %69 = vector.load %arg8[%c0_40, %c0_41] : memref<1x8xf32, #tpu.memory_space<vmem>>, vector<1x8xf32>
      tpu.vector_store %arg8[%c0_40, %c0_41], %68 {strides = array<i32>} : memref<1x8xf32, #tpu.memory_space<vmem>>, vector<1x8xf32>,
      %cst_42 = arith.constant 0.000000e+00 : f32
      %70 = vector.broadcast %cst_42 : f32 to vector<1x8xf32>
      %c0_43 = arith.constant 0 : index
      %c0_44 = arith.constant 0 : index
      %71 = vector.load %arg9[%c0_43, %c0_44] : memref<1x8xf32, #tpu.memory_space<vmem>>, vector<1x8xf32>
      tpu.vector_store %arg9[%c0_43, %c0_44], %70 {strides = array<i32>} : memref<1x8xf32, #tpu.memory_space<vmem>>, vector<1x8xf32>,
    } else {
    }
    %c1_i32 = arith.constant 1 : i32
    %3 = arith.muli %arg0, %c1_i32 : i32
    %4 = arith.addi %3, %arg1 : i32
    %c8_i32 = arith.constant 8 : i32
    %5 = arith.muli %4, %c8_i32 : i32
    %6 = tpu.iota {dimensions = array<i32: 1>} : vector<1x8xi32>
    %7 = vector.broadcast %5 : i32 to vector<1x8xi32>
    %8 = arith.addi %7, %6 : vector<1x8xi32>
    %c8_i32_1 = arith.constant 8 : i32
    %9 = vector.broadcast %c8_i32_1 : i32 to vector<1x8xi32>
    %10 = arith.cmpi slt, %8, %9 : vector<1x8xi32>
    %c0 = arith.constant 0 : index
    %c0_2 = arith.constant 0 : index
    %11 = vector.load %arg2[%c0, %c0_2] : memref<1x8xi32, #tpu.memory_space<vmem>>, vector<1x8xi32>
    %c0_3 = arith.constant 0 : index
    %c0_4 = arith.constant 0 : index
    %12 = vector.load %arg3[%c0_3, %c0_4] : memref<16x8xf32, #tpu.memory_space<vmem>>, vector<16x8xf32>
    %cst = arith.constant 0.000000e+00 : f32
    %13 = vector.broadcast %cst : f32 to vector<1x8xf32>
    %cst_5 = arith.constant 0.000000e+00 : f32
    %14 = vector.broadcast %cst_5 : f32 to vector<1x8xf32>
    %c0_i32_6 = arith.constant 0 : i32
    %15 = vector.broadcast %c0_i32_6 : i32 to vector<1x8xi32>
    %16 = arith.cmpi eq, %11, %15 : vector<1x8xi32>
    %17 = arith.andi %10, %16 : vector<1x8xi1>
    %c0_7 = arith.constant 0 : index
    %c0_8 = arith.constant 0 : index
    %c0_9 = arith.constant 0 : index
    %18 = vector.load %arg4[%c0_7, %c0_8, %c0_9] : memref<2x32x8xf32, #tpu.memory_space<vmem>>, vector<1x32x8xf32>
    %19 = vector.shape_cast %18 : vector<1x32x8xf32> to vector<32x8xf32>
    %c0_10 = arith.constant 0 : index
    %c0_11 = arith.constant 0 : index
    %c0_12 = arith.constant 0 : index
    %20 = vector.load %arg6[%c0_10, %c0_11, %c0_12] : memref<2x16x32xbf16, #tpu.memory_space<vmem>>, vector<1x16x32xbf16>
    %21 = vector.shape_cast %20 : vector<1x16x32xbf16> to vector<16x32xbf16>
    %22 = arith.truncf %19 : vector<32x8xf32> to vector<32x8xbf16>
    %cst_13 = arith.constant dense<0.000000e+00> : vector<16x8xf32>
    %23 = tpu.matmul %21, %22, %cst_13 {dimension_numbers = #tpu.dot_dimension_numbers<[1], [0], [0], [1], [0, 0, 1, 1], [], []>} : vector<16x32xbf16>, vector<32x8xbf16>, vector<16x8xf32> -> vector<16x8xf32>
    %24 = arith.subf %12, %23 : vector<16x8xf32>
    %25 = arith.mulf %24, %24 : vector<16x8xf32>
    %cst_14 = arith.constant dense<0.000000e+00> : vector<8xf32>
    %26 = vector.multi_reduction <add>, %25, %cst_14 [0] : vector<16x8xf32> to vector<8xf32>
    %27 = vector.shape_cast %26 : vector<8xf32> to vector<1x8xf32>
    %28 = math.absf %19 : vector<32x8xf32>
    %cst_15 = arith.constant dense<0.000000e+00> : vector<8xf32>
    %29 = vector.multi_reduction <add>, %28, %cst_15 [0] : vector<32x8xf32> to vector<8xf32>
    %30 = vector.shape_cast %29 : vector<8xf32> to vector<1x8xf32>
    %cst_16 = arith.constant 0.000000e+00 : f32
    %31 = vector.broadcast %cst_16 : f32 to vector<1x8xf32>
    %32 = arith.select %17, %27, %31 : vector<1x8xi1>, vector<1x8xf32>
    %33 = arith.addf %13, %32 : vector<1x8xf32>
    %cst_17 = arith.constant 0.000000e+00 : f32
    %34 = vector.broadcast %cst_17 : f32 to vector<1x8xf32>
    %35 = arith.select %17, %30, %34 : vector<1x8xi1>, vector<1x8xf32>
    %36 = arith.addf %14, %35 : vector<1x8xf32>
    %c1_i32_18 = arith.constant 1 : i32
    %37 = vector.broadcast %c1_i32_18 : i32 to vector<1x8xi32>
    %38 = arith.cmpi eq, %11, %37 : vector<1x8xi32>
    %39 = arith.andi %10, %38 : vector<1x8xi1>
    %c1 = arith.constant 1 : index
    %c0_19 = arith.constant 0 : index
    %c0_20 = arith.constant 0 : index
    %40 = vector.load %arg4[%c1, %c0_19, %c0_20] : memref<2x32x8xf32, #tpu.memory_space<vmem>>, vector<1x32x8xf32>
    %41 = vector.shape_cast %40 : vector<1x32x8xf32> to vector<32x8xf32>
    %c1_21 = arith.constant 1 : index
    %c0_22 = arith.constant 0 : index
    %c0_23 = arith.constant 0 : index
    %42 = vector.load %arg6[%c1_21, %c0_22, %c0_23] : memref<2x16x32xbf16, #tpu.memory_space<vmem>>, vector<1x16x32xbf16>
    %43 = vector.shape_cast %42 : vector<1x16x32xbf16> to vector<16x32xbf16>
    %44 = arith.truncf %41 : vector<32x8xf32> to vector<32x8xbf16>
    %cst_24 = arith.constant dense<0.000000e+00> : vector<16x8xf32>
    %45 = tpu.matmul %43, %44, %cst_24 {dimension_numbers = #tpu.dot_dimension_numbers<[1], [0], [0], [1], [0, 0, 1, 1], [], []>} : vector<16x32xbf16>, vector<32x8xbf16>, vector<16x8xf32> -> vector<16x8xf32>
    %46 = arith.subf %12, %45 : vector<16x8xf32>
    %47 = arith.mulf %46, %46 : vector<16x8xf32>
    %cst_25 = arith.constant dense<0.000000e+00> : vector<8xf32>
    %48 = vector.multi_reduction <add>, %47, %cst_25 [0] : vector<16x8xf32> to vector<8xf32>
    %49 = vector.shape_cast %48 : vector<8xf32> to vector<1x8xf32>
    %50 = math.absf %41 : vector<32x8xf32>
    %cst_26 = arith.constant dense<0.000000e+00> : vector<8xf32>
    %51 = vector.multi_reduction <add>, %50, %cst_26 [0] : vector<32x8xf32> to vector<8xf32>
    %52 = vector.shape_cast %51 : vector<8xf32> to vector<1x8xf32>
    %cst_27 = arith.constant 0.000000e+00 : f32
    %53 = vector.broadcast %cst_27 : f32 to vector<1x8xf32>
    %54 = arith.select %39, %49, %53 : vector<1x8xi1>, vector<1x8xf32>
    %55 = arith.addf %33, %54 : vector<1x8xf32>
    %cst_28 = arith.constant 0.000000e+00 : f32
    %56 = vector.broadcast %cst_28 : f32 to vector<1x8xf32>
    %57 = arith.select %39, %52, %56 : vector<1x8xi1>, vector<1x8xf32>
    %58 = arith.addf %36, %57 : vector<1x8xf32>
    %c0_29 = arith.constant 0 : index
    %c0_30 = arith.constant 0 : index
    %59 = vector.load %arg8[%c0_29, %c0_30] : memref<1x8xf32, #tpu.memory_space<vmem>>, vector<1x8xf32>
    %60 = arith.addf %59, %55 : vector<1x8xf32>
    %c0_31 = arith.constant 0 : index
    %c0_32 = arith.constant 0 : index
    %61 = vector.load %arg8[%c0_31, %c0_32] : memref<1x8xf32, #tpu.memory_space<vmem>>, vector<1x8xf32>
    tpu.vector_store %arg8[%c0_31, %c0_32], %60 {strides = array<i32>} : memref<1x8xf32, #tpu.memory_space<vmem>>, vector<1x8xf32>,
    %c0_33 = arith.constant 0 : index
    %c0_34 = arith.constant 0 : index
    %62 = vector.load %arg9[%c0_33, %c0_34] : memref<1x8xf32, #tpu.memory_space<vmem>>, vector<1x8xf32>
    %63 = arith.addf %62, %58 : vector<1x8xf32>
    %c0_35 = arith.constant 0 : index
    %c0_36 = arith.constant 0 : index
    %64 = vector.load %arg9[%c0_35, %c0_36] : memref<1x8xf32, #tpu.memory_space<vmem>>, vector<1x8xf32>
    tpu.vector_store %arg9[%c0_35, %c0_36], %63 {strides = array<i32>} : memref<1x8xf32, #tpu.memory_space<vmem>>, vector<1x8xf32>,
    %c0_i32_37 = arith.constant 0 : i32
    %65 = arith.cmpi eq, %arg1, %c0_i32_37 : i32
    %66 = arith.extui %65 : i1 to i32
    %c0_i32_38 = arith.constant 0 : i32
    %67 = arith.cmpi ne, %66, %c0_i32_38 : i32
    scf.if %67 {
      %c0_39 = arith.constant 0 : index
      %c0_40 = arith.constant 0 : index
      %c0_41 = arith.constant 0 : index
      %68 = vector.load %arg5[%c0_39, %c0_40, %c0_41] : memref<2x16x32xf32, #tpu.memory_space<vmem>>, vector<1x16x32xf32>
      %69 = vector.shape_cast %68 : vector<1x16x32xf32> to vector<16x32xf32>
      %70 = arith.mulf %69, %69 : vector<16x32xf32>
      %cst_42 = arith.constant dense<0.000000e+00> : vector<32xf32>
      %71 = vector.multi_reduction <add>, %70, %cst_42 [0] : vector<16x32xf32> to vector<32xf32>
      %72 = vector.shape_cast %71 : vector<32xf32> to vector<1x32xf32>
      %cst_43 = arith.constant 1.000000e+00 : f32
      %73 = vector.broadcast %cst_43 : f32 to vector<1x32xf32>
      %74 = arith.subf %72, %73 : vector<1x32xf32>
      %75 = arith.mulf %74, %74 : vector<1x32xf32>
      %76 = vector.shape_cast %75 : vector<1x32xf32> to vector<1x1x32xf32>
      %cst_44 = arith.constant dense<0.000000e+00> : vector<1xf32>
      %77 = vector.multi_reduction <add>, %76, %cst_44 [1, 2] : vector<1x1x32xf32> to vector<1xf32>
      %78 = vector.shape_cast %77 : vector<1xf32> to vector<1x1x1xf32>
      %79 = vector.extract %78[0, 0, 0] : f32 from vector<1x1x1xf32>
      %cst_45 = arith.constant 0.000000e+00 : f32
      %80 = arith.addf %cst_45, %79 : f32
      %c1_46 = arith.constant 1 : index
      %c0_47 = arith.constant 0 : index
      %c0_48 = arith.constant 0 : index
      %81 = vector.load %arg5[%c1_46, %c0_47, %c0_48] : memref<2x16x32xf32, #tpu.memory_space<vmem>>, vector<1x16x32xf32>
      %82 = vector.shape_cast %81 : vector<1x16x32xf32> to vector<16x32xf32>
      %83 = arith.mulf %82, %82 : vector<16x32xf32>
      %cst_49 = arith.constant dense<0.000000e+00> : vector<32xf32>
      %84 = vector.multi_reduction <add>, %83, %cst_49 [0] : vector<16x32xf32> to vector<32xf32>
      %85 = vector.shape_cast %84 : vector<32xf32> to vector<1x32xf32>
      %cst_50 = arith.constant 1.000000e+00 : f32
      %86 = vector.broadcast %cst_50 : f32 to vector<1x32xf32>
      %87 = arith.subf %85, %86 : vector<1x32xf32>
      %88 = arith.mulf %87, %87 : vector<1x32xf32>
      %89 = vector.shape_cast %88 : vector<1x32xf32> to vector<1x1x32xf32>
      %cst_51 = arith.constant dense<0.000000e+00> : vector<1xf32>
      %90 = vector.multi_reduction <add>, %89, %cst_51 [1, 2] : vector<1x1x32xf32> to vector<1xf32>
      %91 = vector.shape_cast %90 : vector<1xf32> to vector<1x1x1xf32>
      %92 = vector.extract %91[0, 0, 0] : f32 from vector<1x1x1xf32>
      %93 = arith.addf %80, %92 : f32
      %c0_52 = arith.constant 0 : index
      %c0_53 = arith.constant 0 : index
      %94 = vector.load %arg8[%c0_52, %c0_53] : memref<1x8xf32, #tpu.memory_space<vmem>>, vector<1x8xf32>
      %95 = vector.shape_cast %94 : vector<1x8xf32> to vector<1x1x8xf32>
      %cst_54 = arith.constant dense<0.000000e+00> : vector<1xf32>
      %96 = vector.multi_reduction <add>, %95, %cst_54 [1, 2] : vector<1x1x8xf32> to vector<1xf32>
      %97 = vector.shape_cast %96 : vector<1xf32> to vector<1x1x1xf32>
      %98 = vector.extract %97[0, 0, 0] : f32 from vector<1x1x1xf32>
      %c0_55 = arith.constant 0 : index
      %c0_56 = arith.constant 0 : index
      %99 = vector.load %arg9[%c0_55, %c0_56] : memref<1x8xf32, #tpu.memory_space<vmem>>, vector<1x8xf32>
      %100 = vector.shape_cast %99 : vector<1x8xf32> to vector<1x1x8xf32>
      %cst_57 = arith.constant dense<0.000000e+00> : vector<1xf32>
      %101 = vector.multi_reduction <add>, %100, %cst_57 [1, 2] : vector<1x1x8xf32> to vector<1xf32>
      %102 = vector.shape_cast %101 : vector<1xf32> to vector<1x1x1xf32>
      %103 = vector.extract %102[0, 0, 0] : f32 from vector<1x1x1xf32>
      %104 = tpu.iota {dimensions = array<i32: 2>} : vector<1x1x128xi32>
      %c0_i32_58 = arith.constant 0 : i32
      %105 = vector.broadcast %c0_i32_58 : i32 to vector<1x1x128xi32>
      %106 = arith.cmpi eq, %104, %105 : vector<1x1x128xi32>
      %cst_59 = arith.constant 0.000000e+00 : f32
      %107 = vector.broadcast %98 : f32 to vector<1x1x128xf32>
      %108 = vector.broadcast %cst_59 : f32 to vector<1x1x128xf32>
      %109 = arith.select %106, %107, %108 : vector<1x1x128xi1>, vector<1x1x128xf32>
      %c1_i32_60 = arith.constant 1 : i32
      %110 = vector.broadcast %c1_i32_60 : i32 to vector<1x1x128xi32>
      %111 = arith.cmpi eq, %104, %110 : vector<1x1x128xi32>
      %cst_61 = arith.constant 0.000000e+00 : f32
      %112 = vector.broadcast %103 : f32 to vector<1x1x128xf32>
      %113 = vector.broadcast %cst_61 : f32 to vector<1x1x128xf32>
      %114 = arith.select %111, %112, %113 : vector<1x1x128xi1>, vector<1x1x128xf32>
      %115 = arith.addf %109, %114 : vector<1x1x128xf32>
      %c2_i32 = arith.constant 2 : i32
      %116 = vector.broadcast %c2_i32 : i32 to vector<1x1x128xi32>
      %117 = arith.cmpi eq, %104, %116 : vector<1x1x128xi32>
      %cst_62 = arith.constant 0.000000e+00 : f32
      %118 = vector.broadcast %93 : f32 to vector<1x1x128xf32>
      %119 = vector.broadcast %cst_62 : f32 to vector<1x1x128xf32>
      %120 = arith.select %117, %118, %119 : vector<1x1x128xi1>, vector<1x1x128xf32>
      %121 = arith.addf %115, %120 : vector<1x1x128xf32>
      %c0_63 = arith.constant 0 : index
      %c0_64 = arith.constant 0 : index
      %c0_65 = arith.constant 0 : index
      %122 = vector.load %arg7[%c0_63, %c0_64, %c0_65] : memref<1x1x128xf32, #tpu.memory_space<vmem>>, vector<1x1x128xf32>
      tpu.vector_store %arg7[%c0_63, %c0_64, %c0_65], %121 {strides = array<i32>} : memref<1x1x128xf32, #tpu.memory_space<vmem>>, vector<1x1x128xf32>,
    } else {
    }
    return
  }
  func.func @transform_0(%arg0: i32, %arg1: i32) -> (i32, i32) {
    %c1_i32 = arith.constant 1 : i32
    %0 = arith.muli %arg0, %c1_i32 : i32
    %1 = arith.addi %0, %arg1 : i32
    %c0_i32 = arith.constant 0 : i32
    %2 = arith.minsi %1, %c0_i32 : i32
    %c0_i32_0 = arith.constant 0 : i32
    %c0_i32_1 = arith.constant 0 : i32
    return %c0_i32_0, %2 : i32, i32
  }
  func.func @transform_1(%arg0: i32, %arg1: i32) -> (i32, i32) {
    %c1_i32 = arith.constant 1 : i32
    %0 = arith.muli %arg0, %c1_i32 : i32
    %1 = arith.addi %0, %arg1 : i32
    %c0_i32 = arith.constant 0 : i32
    %2 = arith.minsi %1, %c0_i32 : i32
    %c0_i32_0 = arith.constant 0 : i32
    %c0_i32_1 = arith.constant 0 : i32
    return %c0_i32_0, %2 : i32, i32
  }
  func.func @transform_2(%arg0: i32, %arg1: i32) -> (i32, i32, i32) {
    %c1_i32 = arith.constant 1 : i32
    %0 = arith.muli %arg0, %c1_i32 : i32
    %1 = arith.addi %0, %arg1 : i32
    %c0_i32 = arith.constant 0 : i32
    %2 = arith.minsi %1, %c0_i32 : i32
    %c0_i32_0 = arith.constant 0 : i32
    %c0_i32_1 = arith.constant 0 : i32
    %c0_i32_2 = arith.constant 0 : i32
    return %c0_i32_0, %c0_i32_1, %2 : i32, i32, i32
  }
  func.func @transform_3(%arg0: i32, %arg1: i32) -> (i32, i32, i32) {
    %c0_i32 = arith.constant 0 : i32
    %c0_i32_0 = arith.constant 0 : i32
    %c0_i32_1 = arith.constant 0 : i32
    %c0_i32_2 = arith.constant 0 : i32
    return %c0_i32, %c0_i32_0, %c0_i32_1 : i32, i32, i32
  }
  func.func @transform_4(%arg0: i32, %arg1: i32) -> (i32, i32, i32) {
    %c0_i32 = arith.constant 0 : i32
    %c0_i32_0 = arith.constant 0 : i32
    %c0_i32_1 = arith.constant 0 : i32
    %c0_i32_2 = arith.constant 0 : i32
    return %c0_i32, %c0_i32_0, %c0_i32_1 : i32, i32, i32
  }
  func.func @transform_5(%arg0: i32, %arg1: i32) -> (i32, i32, i32) {
    %c0_i32 = arith.constant 0 : i32
    %c0_i32_0 = arith.constant 0 : i32
    %c0_i32_1 = arith.constant 0 : i32
    return %arg0, %c0_i32, %c0_i32_0 : i32, i32, i32
  }
}

</mosaic_0001>

<bundles_post_ra>
// kernel: tpu_custom_call.1
= control target key start
LH: loop header
LB: loop body
LE: loop exit
PB: predicated region body
PF: predicated region fallthrough
CT: control target
= control target key end

     0   :  { %vm181_vm0 = vcmask 64512   ;;  %v507_v3 = vmov 0.0   ;;  %vm508_vm1 = vmmov 0   ;;  %vm132_vm2 = vcmask 261120   ;;  %s657_s0 = inlined_call_operand.vmem [shape: s32[1,8], index: 0, kind: input, shape index: {}]   ;;  %s658_s1 = inlined_call_operand.vmem [shape: f32[16,8], index: 1, kind: input, shape index: {}]   ;;  %s659_s2 = inlined_call_operand.vmem [shape: f32[2,32,8], index: 2, kind: input, shape index: {}]   ;;  %s660_s3 = inlined_call_operand.vmem [shape: f32[2,16,32], index: 3, kind: input, shape index: {}]   ;;  %s661_s4 = inlined_call_operand.vmem [shape: bf16[2,16,32], index: 4, kind: input, shape index: {}]   ;;  %s662_s5 = inlined_call_operand.hbm [shape: f32[1,1,128], index: 5, kind: output, shape index: {}]  }
   0x1   :  { %v119_v0 = vld [vmem:[%s659_s2] sm:$0xff]  ;;  %v120_v1 = vld [vmem:[%s659_s2 + $0x8] sm:$0xff]  ;;  %454 = vmatprep.subr.bf16.mxu0 %v507_v3  ;;  %462 = vmatprep.subr.bf16.mxu1 %v507_v3  ;;  %v121_v8 = vld [vmem:[%s659_s2 + $0x10] sm:$0xff] }
   0x2   :  { %v436_v2 = vld [vmem:[%s659_s2 + $0x20] sm:$0xff]  ;;  %v125_v4 = vpack.c.bf16 %v120_v1, %v119_v0  ;;  %v191_v5 = vand.u32 2147483647, %v119_v0  ;;  %v192_v6 = vand.u32 2147483647, %v120_v1  ;;  %v437_v7 = vld [vmem:[%s659_s2 + $0x28] sm:$0xff]  ;;  %458 = vmatprep.mubr.msk.bf16.mxu0 %vm508_vm1, %v507_v3  ;;  %466 = vmatprep.mubr.msk.bf16.mxu1 %vm508_vm1, %v507_v3 }
   0x3   :  { %v222_v9 = vpack.c.bf16 %v437_v7, %v436_v2  ;;  %v286_v10 = vand.u32 2147483647, %v436_v2  ;;  %v287_v11 = vand.u32 2147483647, %v437_v7  ;;  %v122_v12 = vld [vmem:[%s659_s2 + $0x18] sm:$0xff]  ;;  %v438_v13 = vld [vmem:[%s659_s2 + $0x30] sm:$0xff] }
   0x4   :  { %455 = vmatpush3.bf16.msra.mxu0 %v125_v4  ;;  %v195_v14 = vsel %vm181_vm0, %v191_v5, 0.0  ;;  %v196_v15 = vsel %vm181_vm0, %v192_v6, 0.0  ;;  %v126_v16 = vpack.c.bf16 %v122_v12, %v121_v8  ;;  %v193_v17 = vand.u32 2147483647, %v121_v8  ;;  %v439_v18 = vld [vmem:[%s659_s2 + $0x38] sm:$0xff]  ;;  %v481_v27 = vld [vmem:[%s661_s4] sm:$0xff]  }
   0x5   :  { %v197_v19 = vadd.f32 %v196_v15, %v195_v14  ;;  %463 = vmatpush3.bf16.msra.mxu1 %v222_v9  ;;  %v290_v20 = vsel %vm181_vm0, %v286_v10, 0.0  ;;  %v291_v21 = vsel %vm181_vm0, %v287_v11, 0.0  ;;  %456 = vmatprep.subr.bf16.mxu0 %v507_v3  ;;  %v194_v22 = vand.u32 2147483647, %v122_v12  ;;  %v482_v31 = vld [vmem:[%s661_s4 + $0x8] sm:$0xff]  }
   0x6   :  { %v292_v23 = vadd.f32 %v291_v21, %v290_v20  ;;  %464 = vmatprep.subr.bf16.mxu1 %v507_v3  ;;  %v198_v24 = vsel %vm181_vm0, %v193_v17, 0.0  ;;  %v223_v25 = vpack.c.bf16 %v439_v18, %v438_v13  ;;  %v288_v26 = vand.u32 2147483647, %v438_v13 }
   0x7   :  { %v199_v28 = vadd.f32 %v198_v24, %v197_v19  ;;  %v200_v29 = vsel %vm181_vm0, %v194_v22, 0.0  ;;  %v289_v30 = vand.u32 2147483647, %v439_v18 }
   0x8   :  { %457 = vmatpush3.bf16.msra.mxu0 %v126_v16  ;;  %v293_v32 = vsel %vm181_vm0, %v288_v26, 0.0 }
   0x9   :  { %10 = vsyncpa [#allocation5], 0  ;;  %v201_v33 = vadd.f32 %v200_v29, %v199_v28  ;;  %465 = vmatpush3.bf16.msra.mxu1 %v223_v25  ;;  %v294_v34 = vadd.f32 %v293_v32, %v292_v23  ;;  %v295_v35 = vsel %vm181_vm0, %v289_v30, 0.0  ;;  %v317_v41 = vld [vmem:[%s660_s3] sm:$0xff]  ;;  %v318_v42 = vld [vmem:[%s660_s3 + $0x8] sm:$0xff]  ;;  %v109_v55 = vlaneseq  ;;  %s509_s27 = smov [#allocation4]  }
   0xa   :  { %v319_v44 = vmul.f32 %v317_v41, %v317_v41  ;;  %v320_v45 = vmul.f32 %v318_v42, %v318_v42  ;;  %v445_v50 = vld [vmem:[%s660_s3 + $0x10] sm:$0xff]  ;;  %v446_v51 = vld [vmem:[%s660_s3 + $0x18] sm:$0xff]  ;;  %v114_v2 = vld [vmem:[%s657_s0] sm:$0x1]  ;;  %vm104_vm3 = vcmask 57344   ;;  %vm332_vm9 = vcmask 253952  }
   0xb   :  { %v296_v36 = vadd.f32 %v295_v35, %v294_v34  ;;  %459 = vmatmul.mubr.msk.bf16.vlgmr.msra.gmra.mrb[0].mxu0 %vm132_vm2, %v481_v27  ;;  %v202_v37 = vrot.slane %v201_v33, 4  ;;  %v347_v53 = vmul.f32 %v445_v50, %v445_v50  ;;  %v348_v54 = vmul.f32 %v446_v51, %v446_v51  ;;  %105 = vst.msk [vmem:[#allocation2] sm:$0x1] %vm104_vm3, %v507_v3  ;;  %v115_v27 = vld [vmem:[%s658_s1] sm:$0xff]  ;;  %v116_v29 = vld [vmem:[%s658_s1 + $0x8] sm:$0xff]  ;;  %s411_s28 = sshll.u32 %s509_s27, 4  ;;  %s412_s28 = int_to_ptr.vmem [resolvable:$true] %s411_s28 }
   0xc   :  { %467 = vmatmul.mubr.msk.bf16.vlgmr.msra.gmra.mrb[0].mxu1 %vm132_vm2, %v482_v31  ;;  %v321_v46 = vsel %vm132_vm2, %v319_v44, 0.0  ;;  %v322_v47 = vsel %vm132_vm2, %v320_v45, 0.0  ;;  %v602_v63 = vand.u32 127, %v109_v55  ;;  %vm117_vm5 = vcmp.eq.s32.totalorder %v114_v2, 0  ;;  %106 = vst.msk [vmem:[#allocation3] sm:$0x1] %vm104_vm3, %v507_v3  ;;  %p488_p1 = scmp.lt.s32.totalorder %s412_s28, %s412_s28 }
   0xd   :  { %v297_v38 = vrot.slane %v296_v36, 4  ;;  %v203_v39 = vadd.f32 %v202_v37, %v201_v33  ;;  %v323_v49 = vadd.f32 %v322_v47, %v321_v46  ;;  %v349_v57 = vsel %vm132_vm2, %v347_v53, 0.0  ;;  %s483_s29 = scalar_lea.vmem %s412_s28, 16  ;;  %s487_s30 = scalar_lea.vmem %s412_s28, 32 }
   0xe   :  { %v350_v58 = vsel %vm132_vm2, %v348_v54, 0.0  ;;  %vm113_vm4 = vcmp.lt.s32.totalorder %v602_v63, 8  ;;  %vm212_vm7 = vcmp.eq.s32.totalorder %v114_v2, 1  ;;  %vm393_vm10 = vcmp.eq.s32.totalorder %v602_v63, 0  ;;  %p484_p0 = scmp.ne.s32.totalorder %s412_s28, %s483_s29  ;;  %p489_p2 = scmp.lt.s32.totalorder %s487_s30, %s483_s29 }
   0xf   :  { %v298_v40 = vadd.f32 %v297_v38, %v296_v36  ;;  %v204_v43 = vrot.slane %v203_v39, 2  ;;  %v324_v56 = vrot.slane %v323_v49, 4  ;;  %v351_v61 = vadd.f32 %v350_v58, %v349_v57  ;;  %vm612_vm6 = vmand %vm113_vm4, %vm117_vm5 }
  0x10   :  { %vm618_vm8 = vmand %vm113_vm4, %vm212_vm7  ;;  %vm396_vm11 = vcmp.eq.s32.totalorder %v602_v63, 1  ;;  %vm400_vm12 = vcmp.eq.s32.totalorder %v602_v63, 2  ;;  %p490_p3 = por %p489_p2, %p488_p1 }
  0x11   :  { %v299_v48 = vrot.slane %v298_v40, 2  ;;  %v205_v52 = vadd.f32 %v204_v43, %v203_v39  ;;  %v325_v60 = vadd.f32 %v324_v56, %v323_v49  ;;  %v352_v1 = vrot.slane %v351_v61, 4 }
  0x12   :  { %v307_v2 = vld [vmem:[#allocation2] sm:$0x1]  ;;  %p491_p4 = pnand %p490_p3, %p484_p0 }
  0x13   :  { %v300_v59 = vadd.f32 %v299_v48, %v298_v40  ;;  %v206_v62 = vrot.slane %v205_v52, 1  ;;  %v326_v0 = vrot.slane %v325_v60, 2  ;;  %v353_v6 = vadd.f32 %v352_v1, %v351_v61  ;;  %v311_v24 = vld [vmem:[#allocation3] sm:$0x1] }
  0x15   :  { %v301_v4 = vrot.slane %v300_v59, 1  ;;  %v327_v5 = vadd.f32 %v326_v0, %v325_v60  ;;  %v207_v7 = vadd.f32 %v206_v62, %v205_v52  ;;  %v354_v9 = vrot.slane %v353_v6, 2 }
  0x17   :  { %v328_v8 = vrot.slane %v327_v5, 1  ;;  %v302_v10 = vadd.f32 %v301_v4, %v300_v59  ;;  %v355_v12 = vadd.f32 %v354_v9, %v353_v6  ;;  %v210_v14 = vsel %vm612_vm6, %v207_v7, 0.0 }
  0x19   :  { %v329_v11 = vadd.f32 %v328_v8, %v327_v5  ;;  %v356_v16 = vrot.slane %v355_v12, 1  ;;  %v305_v3 = vsel %vm618_vm8, %v302_v10, 0.0 }
  0x1a   :  { %v306_v20 = vadd.f32 %v305_v3, %v210_v14 }
  0x1b   :  { %v444_v15 = vadd.f32 -1.0, %v329_v11  ;;  %v357_v19 = vadd.f32 %v356_v16, %v355_v12 }
  0x1c   :  { %v312_v25 = vadd.f32 %v311_v24, %v306_v20 }
  0x1d   :  { %v331_v18 = vmul.f32 %v444_v15, %v444_v15  ;;  %v447_v22 = vadd.f32 -1.0, %v357_v19 }
  0x1e   :  { %313 = vst.msk [vmem:[#allocation3] sm:$0x1] %vm104_vm3, %v312_v25 }
  0x1f   :  { %v333_v21 = vsel %vm332_vm9, %v331_v18, 0.0  ;;  %v359_v23 = vmul.f32 %v447_v22, %v447_v22 }
  0x20   :  { %334 = vadd.xlane.f32.xlu0 %v333_v21 }
  0x21   :  { %v360_v26 = vsel %vm332_vm9, %v359_v23, 0.0 }
  0x24   :  { %361 = vadd.xlane.f32.xlu0 %v360_v26 }
  0x25   :  { %v382_v7 = vld [vmem:[#allocation3] sm:$0x1] }
  0x26   :  { %v383_v9 = vsel %vm104_vm3, %v382_v7, 0.0 }
  0xad   :  { %v335_v10 = vpop.xlane.xlu0 %334 }
  0xae   :  { %v336_v11 = vrot.slane %v335_v10, 4 }
  0xb0   :  { %v337_v12 = vadd.f32 %v336_v11, %v335_v10 }
  0xb1   :  { %v362_v13 = vpop.xlane.xlu0 %361 }
  0xb2   :  { %v363_v14 = vrot.slane %v362_v13, 4  ;;  %v338_v15 = vrot.slane %v337_v12, 2 }
  0xb4   :  { %v364_v16 = vadd.f32 %v363_v14, %v362_v13  ;;  %v339_v18 = vadd.f32 %v338_v15, %v337_v12 }
  0xb6   :  { %v365_v17 = vrot.slane %v364_v16, 2  ;;  %v340_v19 = vrot.slane %v339_v18, 1 }
  0xb8   :  { %v366_v3 = vadd.f32 %v365_v17, %v364_v16  ;;  %v341_v21 = vadd.f32 %v340_v19, %v339_v18 }
  0xba   :  { %v367_v20 = vrot.slane %v366_v3, 1  ;;  %470 = vpush %v341_v21 }
  0xbc   :  { %v368_v22 = vadd.f32 %v367_v20, %v366_v3 }
  0xbe   :  { %472 = vpush %v368_v22 }
  0xde   :  { %v170_v28 = vpop.f32.mrb[0].mxu0 }
  0xdf   :  { %v177_v30 = vsub.f32 %v115_v27, %v170_v28  ;;  %v266_v31 = vpop.f32.mrb[0].mxu1  ;;  %v460_v32 = vpop.f32.mrb[1].mxu0 }
  0xe0   :  { %v273_v33 = vsub.f32 %v115_v27, %v266_v31  ;;  %v468_v34 = vpop.f32.mrb[1].mxu1  ;;  %v173_v35 = vpop.f32.mrb[2].mxu0 }
  0xe1   :  { %v179_v36 = vmul.f32 %v177_v30, %v177_v30  ;;  %v178_v37 = vsub.f32 %v116_v29, %v173_v35  ;;  %v269_v38 = vpop.f32.mrb[2].mxu1  ;;  %v461_v39 = vpop.f32.mrb[3].mxu0 }
  0xe2   :  { %v275_v40 = vmul.f32 %v273_v33, %v273_v33  ;;  %v274_v41 = vsub.f32 %v116_v29, %v269_v38  ;;  %v469_v42 = vpop.f32.mrb[3].mxu1 }
  0xe3   :  { %v180_v43 = vmul.f32 %v178_v37, %v178_v37  ;;  %v182_v45 = vsel %vm181_vm0, %v179_v36, 0.0 }
  0xe4   :  { %v276_v44 = vmul.f32 %v274_v41, %v274_v41  ;;  %v277_v47 = vsel %vm181_vm0, %v275_v40, 0.0 }
  0xe5   :  { %v183_v46 = vsel %vm181_vm0, %v180_v43, 0.0 }
  0xe6   :  { %v184_v48 = vadd.f32 %v183_v46, %v182_v45  ;;  %v278_v49 = vsel %vm181_vm0, %v276_v44, 0.0 }
  0xe7   :  { %v279_v50 = vadd.f32 %v278_v49, %v277_v47 }
  0xe8   :  { %v185_v51 = vrot.slane %v184_v48, 4 }
  0xe9   :  { %v280_v52 = vrot.slane %v279_v50, 4 }
  0xea   :  { %v186_v53 = vadd.f32 %v185_v51, %v184_v48 }
  0xeb   :  { %v281_v54 = vadd.f32 %v280_v52, %v279_v50  ;;  %s471_s1 = spop %470 }
  0xec   :  { %v187_v55 = vrot.slane %v186_v53, 2 }
  0xed   :  { %v282_v56 = vrot.slane %v281_v54, 2 }
  0xee   :  { %v188_v57 = vadd.f32 %v187_v55, %v186_v53 }
  0xef   :  { %v283_v58 = vadd.f32 %v282_v56, %v281_v54  ;;  %s473_s23 = spop %472 }
  0xf0   :  { %v189_v59 = vrot.slane %v188_v57, 1  ;;  %s370_s25 = sadd.f32 %s473_s23, %s471_s1 }
  0xf1   :  { %v284_v60 = vrot.slane %v283_v58, 1 }
  0xf2   :  { %v190_v61 = vadd.f32 %v189_v59, %v188_v57  ;;  %v401_v38 = vstv %s370_s25 }
  0xf3   :  { %v285_v62 = vadd.f32 %v284_v60, %v283_v58  ;;  %v402_v43 = vsel %vm400_vm12, %v401_v38, 0.0 }
  0xf4   :  { %v208_v0 = vsel %vm612_vm6, %v190_v61, 0.0 }
  0xf5   :  { %v303_v1 = vsel %vm618_vm8, %v285_v62, 0.0 }
  0xf6   :  { %v304_v4 = vadd.f32 %v303_v1, %v208_v0 }
  0xf8   :  { %v308_v5 = vadd.f32 %v307_v2, %v304_v4 }
  0xfa   :  { %310 = vst.msk [vmem:[#allocation2] sm:$0x1] %vm104_vm3, %v308_v5 }
 0x101   :  { %v371_v6 = vld [vmem:[#allocation2] sm:$0x1] }
 0x102   :  { %v372_v8 = vsel %vm104_vm3, %v371_v6, 0.0 }
 0x103   :  { %373 = vadd.xlane.f32.xlu1 %v372_v8 }
 0x107   :  { %384 = vadd.xlane.f32.xlu1 %v383_v9 }
 0x190   :  { %v374_v23 = vpop.xlane.xlu1 %373 }
 0x191   :  { %v375_v24 = vrot.slane %v374_v23, 4 }
 0x193   :  { %v376_v25 = vadd.f32 %v375_v24, %v374_v23 }
 0x194   :  { %v385_v26 = vpop.xlane.xlu1 %384 }
 0x195   :  { %v377_v27 = vrot.slane %v376_v25, 2  ;;  %v386_v28 = vrot.slane %v385_v26, 4 }
 0x197   :  { %v387_v29 = vadd.f32 %v386_v28, %v385_v26  ;;  %v378_v30 = vadd.f32 %v377_v27, %v376_v25 }
 0x199   :  { %v388_v31 = vrot.slane %v387_v29, 2  ;;  %v379_v32 = vrot.slane %v378_v30, 1 }
 0x19b   :  { %v389_v33 = vadd.f32 %v388_v31, %v387_v29  ;;  %v380_v34 = vadd.f32 %v379_v32, %v378_v30 }
 0x19d   :  { %474 = vpush %v380_v34  ;;  %v390_v35 = vrot.slane %v389_v33, 1 }
 0x19f   :  { %v391_v36 = vadd.f32 %v390_v35, %v389_v33 }
 0x1a1   :  { %476 = vpush %v391_v36 }
 0x1ce   :  { %s475_s24 = spop %474 }
 0x1cf   :  { %v394_v37 = vstv %s475_s24 }
 0x1d0   :  { %v395_v40 = vsel %vm393_vm10, %v394_v37, 0.0 }
 0x1d2   :  { %s477_s26 = spop %476 }
 0x1d3   :  { %v397_v39 = vstv %s477_s26 }
 0x1d4   :  { %v398_v41 = vsel %vm396_vm11, %v397_v39, 0.0 }
 0x1d5   :  { %v399_v42 = vadd.f32 %v398_v41, %v395_v40 }
 0x1d7   :  { %v403_v44 = vadd.f32 %v402_v43, %v399_v42 }
 0x1d9   :  { %404 = vst [vmem:[#allocation4] sm:$0x1] %v403_v44 }
 0x1da   :  { %494 = shalt.err (!%p491_p4)
}
 0x1db   :  { %s495_s8 = scalar_lea.hbm %s662_s5, 16 }
 0x1dc   :  { %p496_p5 = scmp.ne.s32.totalorder %s662_s5, %s495_s8  ;;  %p499_p6 = scmp.lt.u32.totalorder %s495_s8, %s662_s5 }
 0x1de   :  { %p501_p7 = pnand %p499_p6, %p496_p5 }
 0x1e0   :  { %504 = shalt.err (!%p501_p7)
}
 0x1e1   :  { %414 = dma.vmem_to_hbm [thread:$0]  %s412_s28, 16, %s662_s5, [#allocation5]  }
 0x1e2   :  { %505 = dma.done.wait [#allocation5], 16  }
 0x1e3   :  { %506 = vsyncadd [#allocation5], 4294967280 }
 0x1e4   :  { %418 = vsyncpa [#allocation5], 1 }

</bundles_post_ra>
